<compile_context>
chip_gen: v6e
topology: v6e:2x2x1
jax: 0.10.0
libtpu: 0.0.40
codegen_flags: <defaults>
</compile_context>

<pallas_src>
import functools

import jax
import jax.numpy as jnp
from jax.experimental import pallas as pl
from jax.experimental.pallas import tpu as pltpu

_BP = 128  # lane-width padding for the batch dimension


def _cox_loss_kernel(packed_ref, out_ref, *, batch, reduction):
    packed = packed_ref[...]                  # (8, Bp) single VMEM tile
    theta = packed[0:1, :]                    # (1, Bp)  risk scores
    st_row = packed[1:2, :]                   # (1, Bp)  survival times (i-indexed)
    censor = packed[2:3, :]                   # (1, Bp)  censorship flags

    # Valid-lane / event masks computed in-kernel (no extra inputs / DMAs).
    valid = jax.lax.broadcasted_iota(jnp.int32, (1, _BP), 1) < batch        # (1, Bp) bool
    events = jnp.where(valid, (censor == 0.0).astype(jnp.float32), 0.0)     # (1, Bp)

    # Max-stabilised exp over the valid lanes.  where() (not mask-multiply) so
    # a padded-lane exp overflow can never become inf * 0 = NaN.
    m = jnp.max(jnp.where(valid, theta, -jnp.inf), axis=1, keepdims=True)   # (1, 1)
    exp_theta = jnp.where(valid, jnp.exp(theta - m), 0.0)                   # (1, Bp)

    # Column-oriented survtime via one XLU transpose of the aligned (8, Bp)
    # tile (row 1 of the transpose), replacing the former second input.
    st_col = jnp.transpose(packed)[:, 1:2]                                  # (Bp, 1)

    # Transposed risk-set mask: M[j, i] = (survtime[j] >= survtime[i]).
    mask = (st_col >= st_row).astype(jnp.float32)                           # (Bp, Bp)

    # risk[i] = sum_j exp(theta_j - m) * M[j, i]  via a single MXU matmul.
    # LHS broadcast to 8 sublanes keeps a known-good MXU operand shape; the
    # 8 result rows are identical, keep row 0 -> lane-dense (1, Bp).
    lhs = jnp.broadcast_to(exp_theta, (8, _BP))                             # (8, Bp)
    risk = jnp.dot(lhs, mask, preferred_element_type=jnp.float32)[0:1, :]   # (1, Bp)
    risk = jnp.where(valid, risk, 1.0)   # keep log() finite on padded lanes

    log_risk = jnp.log(risk) + m                                            # (1, Bp)
    per_sample = (theta - log_risk) * events                                # (1, Bp)

    total = jnp.sum(per_sample, axis=1, keepdims=True)                      # (1, 1)
    num_events = jnp.sum(events, axis=1, keepdims=True)                     # (1, 1)

    # Scalar divisions hoisted past the reduction.  Matches the reference,
    # which also divides by num_events (NaN/Inf when there are zero events;
    # the PyTorch module guards that via .check()).
    if reduction == 'mean':
        loss = -total / (num_events * float(batch))
    else:  # 'sum'
        loss = -total / num_events
    out_ref[...] = loss


def _cox_loss_impl(z, c_t, reduction='mean'):
    assert reduction in ('mean', 'sum')
    batch = z.shape[0]
    assert batch <= _BP, "this kernel handles batch <= 128"
    pad = _BP - batch

    theta = z.reshape(-1).astype(jnp.float32)
    censor = c_t[:, 0].astype(jnp.float32)
    survtime = c_t[:, 1].astype(jnp.float32)

    # One packed lane-dense tile: row 0 = theta, row 1 = survtime, row 2 = censor.
    packed = jnp.stack([theta, survtime, censor], axis=0)          # (3, batch)
    packed = jnp.pad(packed, ((0, 8 - 3), (0, pad)))               # (8, Bp)

    out = pl.pallas_call(
        functools.partial(_cox_loss_kernel, batch=batch, reduction=reduction),
        out_shape=jax.ShapeDtypeStruct((1, 1), jnp.float32),
        in_specs=[pl.BlockSpec((8, _BP), lambda: (0, 0))],
        out_specs=pl.BlockSpec((1, 1), lambda: (0, 0)),
        compiler_params=pltpu.CompilerParams(
            # Let XLA fuse the stack/pad packing into the pallas_call instead
            # of running it as a separate fusion with an HBM round-trip.
            allow_input_fusion=[True],
        ),
    )(packed)
    return out[0, 0]


# Jit the wrapper so the packing can actually fuse into the kernel launch.
cox_loss = jax.jit(_cox_loss_impl, static_argnames='reduction')


def cox_loss_ref(z, c_t, reduction='mean'):
    """Pure-JAX reference mirroring the PyTorch forward pass."""
    theta = z.reshape(-1).astype(jnp.float32)
    censor = c_t[:, 0] != 0
    events = (~censor).astype(jnp.float32)
    survtime = c_t[:, 1].astype(jnp.float32)
    r_mat = (survtime[None, :] >= survtime[:, None]).astype(jnp.float32)
    exp_theta = jnp.exp(theta)
    summands = theta - jnp.log(jnp.sum(exp_theta[None, :] * r_mat, axis=1))
    summands = summands * events / jnp.sum(events)
    if reduction == 'mean':
        return -jnp.mean(summands)
    return -jnp.sum(summands)


if __name__ == "__main__":
    key = jax.random.PRNGKey(0)
    k1, k2, k3 = jax.random.split(key, 3)

    batch = 8
    # predicted risk scores (batch, 1)
    z = jax.random.normal(k1, (batch, 1), dtype=jnp.float32)
    # censorship flags (0 = event observed, 1 = censored); force >= 1 event
    censor = jax.random.bernoulli(k2, 0.4, (batch,)).astype(jnp.float32)
    censor = censor.at[0].set(0.0)
    # survival times
    survtime = jax.random.uniform(k3, (batch,), dtype=jnp.float32,
                                  minval=0.1, maxval=10.0)
    c_t = jnp.stack([censor, survtime], axis=1)  # (batch, 2)

    ok = True
    for reduction in ('mean', 'sum'):
        loss = jax.block_until_ready(cox_loss(z, c_t, reduction=reduction))
        ref = jax.block_until_ready(cox_loss_ref(z, c_t, reduction=reduction))
        if not jnp.allclose(loss, ref, rtol=1e-4, atol=1e-5):
            ok = False
            print(f"MISMATCH ({reduction}): kernel={loss} ref={ref}")

    if ok:
        print("KERNEL_OK")
</pallas_src>

<mosaic_0001>
module attributes {stable_mosaic.version = 11 : i64} {
  func.func @_cox_loss_kernel(%arg0: memref<8x128xf32, #tpu.memory_space<vmem>>, %arg1: memref<1x1xf32, #tpu.memory_space<vmem>>) attributes {dimension_semantics = [], scalar_prefetch = 0 : i64, scratch_operands = 0 : i64, tpu.core_type = #tpu.core_type<tc>} {
    %c0 = arith.constant 0 : index
    %c0_0 = arith.constant 0 : index
    %0 = vector.load %arg0[%c0, %c0_0] : memref<8x128xf32, #tpu.memory_space<vmem>>, vector<8x128xf32>
    %1 = vector.extract_strided_slice %0 {offsets = [0, 0], sizes = [1, 128], strides = [1, 1]} : vector<8x128xf32> to vector<1x128xf32>
    %2 = vector.extract_strided_slice %0 {offsets = [1, 0], sizes = [1, 128], strides = [1, 1]} : vector<8x128xf32> to vector<1x128xf32>
    %3 = vector.extract_strided_slice %0 {offsets = [2, 0], sizes = [1, 128], strides = [1, 1]} : vector<8x128xf32> to vector<1x128xf32>
    %4 = tpu.iota {dimensions = array<i32: 1>} : vector<1x128xi32>
    %c8_i32 = arith.constant 8 : i32
    %5 = vector.broadcast %c8_i32 : i32 to vector<1x128xi32>
    %6 = arith.cmpi slt, %4, %5 : vector<1x128xi32>
    %cst = arith.constant 0.000000e+00 : f32
    %7 = vector.broadcast %cst : f32 to vector<1x128xf32>
    %8 = arith.cmpf oeq, %3, %7 : vector<1x128xf32>
    %9 = arith.extui %8 : vector<1x128xi1> to vector<1x128xi32>
    %10 = arith.sitofp %9 : vector<1x128xi32> to vector<1x128xf32>
    %cst_1 = arith.constant 0.000000e+00 : f32
    %11 = vector.broadcast %cst_1 : f32 to vector<1x128xf32>
    %12 = arith.select %6, %10, %11 : vector<1x128xi1>, vector<1x128xf32>
    %cst_2 = arith.constant 0xFF800000 : f32
    %13 = vector.broadcast %cst_2 : f32 to vector<1x128xf32>
    %14 = arith.select %6, %1, %13 : vector<1x128xi1>, vector<1x128xf32>
    %cst_3 = arith.constant dense<0xFF800000> : vector<1xf32>
    %15 = vector.multi_reduction <maximumf>, %14, %cst_3 [1] : vector<1x128xf32> to vector<1xf32>
    %16 = vector.shape_cast %15 : vector<1xf32> to vector<1x1xf32>
    %17 = vector.broadcast %16 : vector<1x1xf32> to vector<1x128xf32>
    %18 = arith.subf %1, %17 : vector<1x128xf32>
    %19 = math.exp %18 : vector<1x128xf32>
    %cst_4 = arith.constant 0.000000e+00 : f32
    %20 = vector.broadcast %cst_4 : f32 to vector<1x128xf32>
    %21 = arith.select %6, %19, %20 : vector<1x128xi1>, vector<1x128xf32>
    %22 = tpu.transpose %0, [1, 0] : vector<8x128xf32> -> vector<128x8xf32>
    %23 = vector.extract_strided_slice %22 {offsets = [0, 1], sizes = [128, 1], strides = [1, 1]} : vector<128x8xf32> to vector<128x1xf32>
    %24 = vector.broadcast %23 : vector<128x1xf32> to vector<128x128xf32>
    %25 = vector.broadcast %2 : vector<1x128xf32> to vector<128x128xf32>
    %26 = arith.cmpf oge, %24, %25 : vector<128x128xf32>
    %27 = arith.extui %26 : vector<128x128xi1> to vector<128x128xi32>
    %28 = arith.sitofp %27 : vector<128x128xi32> to vector<128x128xf32>
    %29 = vector.shape_cast %21 : vector<1x128xf32> to vector<1x128xf32>
    %30 = vector.broadcast %29 : vector<1x128xf32> to vector<8x128xf32>
    %cst_5 = arith.constant dense<0.000000e+00> : vector<8x128xf32>
    %31 = tpu.matmul %30, %28, %cst_5 {dimension_numbers = #tpu.dot_dimension_numbers<[1], [0], [0], [1], [0, 0, 1, 1], [], []>} : vector<8x128xf32>, vector<128x128xf32>, vector<8x128xf32> -> vector<8x128xf32>
    %32 = vector.extract_strided_slice %31 {offsets = [0, 0], sizes = [1, 128], strides = [1, 1]} : vector<8x128xf32> to vector<1x128xf32>
    %cst_6 = arith.constant 1.000000e+00 : f32
    %33 = vector.broadcast %cst_6 : f32 to vector<1x128xf32>
    %34 = arith.select %6, %32, %33 : vector<1x128xi1>, vector<1x128xf32>
    %35 = math.log %34 : vector<1x128xf32>
    %36 = vector.broadcast %16 : vector<1x1xf32> to vector<1x128xf32>
    %37 = arith.addf %35, %36 : vector<1x128xf32>
    %38 = arith.subf %1, %37 : vector<1x128xf32>
    %39 = arith.mulf %38, %12 : vector<1x128xf32>
    %cst_7 = arith.constant dense<0.000000e+00> : vector<1xf32>
    %40 = vector.multi_reduction <add>, %39, %cst_7 [1] : vector<1x128xf32> to vector<1xf32>
    %41 = vector.shape_cast %40 : vector<1xf32> to vector<1x1xf32>
    %cst_8 = arith.constant dense<0.000000e+00> : vector<1xf32>
    %42 = vector.multi_reduction <add>, %12, %cst_8 [1] : vector<1x128xf32> to vector<1xf32>
    %43 = vector.shape_cast %42 : vector<1xf32> to vector<1x1xf32>
    %cst_9 = arith.constant 0.000000e+00 : f32
    %44 = vector.broadcast %cst_9 : f32 to vector<1x1xf32>
    %45 = arith.subf %44, %41 : vector<1x1xf32>
    %cst_10 = arith.constant 8.000000e+00 : f32
    %46 = vector.broadcast %cst_10 : f32 to vector<1x1xf32>
    %47 = arith.mulf %43, %46 : vector<1x1xf32>
    %48 = arith.divf %45, %47 : vector<1x1xf32>
    %c0_11 = arith.constant 0 : index
    %c0_12 = arith.constant 0 : index
    %49 = vector.load %arg1[%c0_11, %c0_12] : memref<1x1xf32, #tpu.memory_space<vmem>>, vector<1x1xf32>
    tpu.vector_store %arg1[%c0_11, %c0_12], %48 {strides = array<i32>} : memref<1x1xf32, #tpu.memory_space<vmem>>, vector<1x1xf32>,
    return
  }
}

</mosaic_0001>

<bundles_post_ra>
// kernel: _cox_loss_impl.2
= control target key start
LH: loop header
LB: loop body
LE: loop exit
PB: predicated region body
PF: predicated region fallthrough
CT: control target
= control target key end

     0   :  { %s773_s0 = inlined_call_operand.vmem [shape: f32[1,8], index: 0, kind: input, shape index: {}]   ;;  %s774_s1 = inlined_call_operand.<no memory space> [shape: f32[], index: 1, kind: input, shape index: {}]   ;;  %s775_s2 = inlined_call_operand.vmem [shape: f32[1,8], index: 2, kind: input, shape index: {}]   ;;  %s776_s3 = inlined_call_operand.vmem [shape: f32[1,8], index: 3, kind: input, shape index: {}]   ;;  %s777_s4 = inlined_call_operand.<no memory space> [shape: s32[], index: 4, kind: input, shape index: {}]   ;;  %s778_s5 = inlined_call_operand.<no memory space> [shape: f32[], index: 5, kind: input, shape index: {}]   ;;  %s779_s6 = inlined_call_operand.<no memory space> [shape: s32[], index: 6, kind: input, shape index: {}]   ;;  %s780_s7 = inlined_call_operand.hbm [shape: f32[1,1], index: 7, kind: output, shape index: {}]  }
   0x1   :  { %v12_v0 = vstv %s774_s1  ;;  %v15_v1 = vstv %s777_s4  ;;  %v16_v2 = vstv %s778_s5  ;;  %v17_v3 = vstv %s779_s6 }
   0x2   :  { %v79_v4 = vlaneseq }
   0x3   :  { %18 = vsyncpa [#allocation18], 0  ;;  %v111_v7 = vld [vmem:[%s776_s3] sm:$0x1]  ;;  %vm89_vm5 = vcmask 1045504   ;;  %vm108_vm6 = vcmask 1046528  }
   0x4   :  { %v658_v5 = vshrl.u32 %v79_v4, 7  ;;  %v660_v6 = vand.u32 127, %v79_v4  ;;  %v78_v8 = vld [vmem:[%s773_s0] sm:$0x1]  ;;  %vm188_vm8 = vcmask 1040384   ;;  %v601_v32 = vmov 1  }
   0x5   :  { %v97_v10 = vld [vmem:[%s775_s2] sm:$0x1]  ;;  %572 = vset.pattern.permute.xlu1 %v601_v32  ;;  %v602_v48 = vmov 0.0   ;;  %vm603_vm9 = vmmov 0   ;;  %v604_v56 = vmov 1.0   ;;  %s605_s0 = smov [#allocation17]  }
   0x6   :  { %v81_v9 = vadd.s32 8, %v658_v5  ;;  %vm115_vm0 = vcmp.lt.s32.totalorder %v658_v5, 1  ;;  %vm87_vm1 = vcmp.lt.s32.totalorder %v660_v6, 8  ;;  %vm675_vm2 = vcmp.lt.s32.totalorder %v658_v5, %v17_v3  ;;  %531 = vmatprep.subr.mxu0 %v602_v48  ;;  %563 = vmatprep.mubr.msk.f32.mxu0 %vm603_vm9, %v602_v48  ;;  %s465_s2 = sshll.u32 %s605_s0, 4  ;;  %s466_s2 = int_to_ptr.vmem [resolvable:$true] %s465_s2 }
   0x7   :  { %v116_v11 = vsel %vm115_vm0, %v111_v7, %v12_v0  ;;  %vm137_vm3 = vcmp.lt.s32.totalorder %v660_v6, %v15_v1  ;;  %v310_v51 = vsub.s32 1, %v658_v5  ;;  %s579_s3 = scalar_lea.vmem %s466_s2, 16  ;;  %s583_s6 = scalar_lea.vmem %s466_s2, 32 }
   0x8   :  { %vm82_vm4 = vcmp.lt.s32.totalorder %v81_v9, 9  ;;  %v121_v13 = vsel %vm87_vm1, %v116_v11, %v12_v0  ;;  %vm479_vm7 = vmand %vm675_vm2, %vm137_vm3  ;;  %v362_v9 = vsub.s32 0, %v658_v5  ;;  %p580_p0 = scmp.ne.s32.totalorder %s466_s2, %s579_s3  ;;  %p584_p1 = scmp.lt.s32.totalorder %s466_s2, %s466_s2 }
   0x9   :  { %v83_v14 = vsel %vm82_vm4, %v78_v8, %v12_v0  ;;  %v102_v15 = vsel %vm82_vm4, %v97_v10, %v12_v0  ;;  %v143_v18 = vsel %vm675_vm2, %v121_v13, %v16_v2  ;;  %p585_p2 = scmp.lt.s32.totalorder %s583_s6, %s579_s3 }
   0xa   :  { %v88_v16 = vsel %vm87_vm1, %v83_v14, %v12_v0  ;;  %v107_v17 = vsel %vm87_vm1, %v102_v15, %v12_v0  ;;  %v148_v23 = vsel %vm479_vm7, %v143_v18, %v16_v2 }
   0xb   :  { %v90_v19 = vsel %vm89_vm5, %v88_v16, %v12_v0  ;;  %v109_v20 = vsel %vm108_vm6, %v107_v17, %v12_v0  ;;  %p586_p3 = por %p585_p2, %p584_p1 }
   0xc   :  { %v91_v21 = vrot.slane %v90_v19, 6  ;;  %v110_v22 = vrot.slane %v109_v20, 7 }
   0xd   :  { %p587_p4 = pnand %p586_p3, %p580_p0 }
   0xe   :  { %v152_v24 = vsel %vm675_vm2, %v110_v22, %v16_v2  ;;  %v165_v25 = vsel %vm675_vm2, %v91_v21, %v16_v2 }
   0xf   :  { %v157_v26 = vsel %vm479_vm7, %v152_v24, %v16_v2  ;;  %v170_v27 = vsel %vm479_vm7, %v165_v25, %v16_v2 }
  0x10   :  { %v161_v28 = vmax.f32 %v148_v23, %v157_v26 }
  0x12   :  { %v694_v29 = vmax.f32 %v161_v28, %v170_v27 }
  0x14   :  { %196 = vxpose.xlu0.b32.start.end [1/1] (short) %v694_v29, 128  ;;  %v187_v30 = vsel %vm87_vm1, %v694_v29, -inf  ;;  %v707_v53 = vrot.slane %v694_v29, %v310_v51 }
  0x15   :  { %v189_v31 = vsel %vm188_vm8, %v187_v30, -inf }
  0x16   :  { %190 = vmax.xlane.f32.xlu1 %v189_v31 }
  0x3d   :  { %571 = vset.pattern.permute.xlu0 %v601_v32 }
  0x90   :  { %v212_v33 = vpop.trf.xlu0 }
  0x94   :  { %v213_v34 = vpop.trf.xlu0 }
  0x98   :  { %v214_v35 = vpop.trf.xlu0 }
  0x9c   :  { %v215_v36 = vpop.trf.xlu0 }
  0x9f   :  { %v703_v50 = vpop.xlane.xlu1 %190 }
  0xa0   :  { %v216_v37 = vpop.trf.xlu0  ;;  %v192_v62 = vsub.f32 %v694_v29, %v703_v50 }
  0xa2   :  { %v193_v0 = vmul.f32 1.442695, %v192_v62 }
  0xa4   :  { %v217_v38 = vpop.trf.xlu0  ;;  %573 = vpow2.f32 %v193_v0 }
  0xa8   :  { %v218_v39 = vpop.trf.xlu0 }
  0xac   :  { %v219_v40 = vpop.trf.xlu0 }
  0xb0   :  { %v220_v41 = vpop.trf.xlu0 }
  0xb1   :  { %v574_v8 = vpop.eup %573 }
  0xb2   :  { %v195_v12 = vsel %vm87_vm1, %v574_v8, 0.0 }
  0xb3   :  { %v363_v13 = vrot.slane %v195_v12, %v362_v9 }
  0xb4   :  { %v221_v42 = vpop.trf.xlu0 }
  0xb8   :  { %v222_v43 = vpop.trf.xlu0 }
  0xbc   :  { %v223_v44 = vpop.trf.xlu0 }
  0xc0   :  { %v224_v45 = vpop.trf.xlu0 }
  0xc4   :  { %v225_v46 = vpop.trf.xlu0 }
  0xc8   :  { %v226_v47 = vpop.trf.xlu0 }
  0xc9   :  { %300 = vperm.xlu1 %572, %v226_v47  }
  0xcc   :  { %v227_v49 = vpop.trf.xlu0 }
  0xcd   :  { %305 = vperm.xlu0 %571, %v227_v49   ;;  %295 = vperm.xlu1 %572, %v225_v46  }
  0xd1   :  { %230 = vperm.xlu0 %571, %v212_v33   ;;  %290 = vperm.xlu1 %572, %v224_v45  }
  0xd5   :  { %285 = vperm.xlu1 %572, %v223_v44  }
  0xd9   :  { %280 = vperm.xlu1 %572, %v222_v43  }
  0xdd   :  { %275 = vperm.xlu1 %572, %v221_v42  }
  0xe1   :  { %270 = vperm.xlu1 %572, %v220_v41  }
  0xe5   :  { %265 = vperm.xlu1 %572, %v219_v40  }
  0xe9   :  { %260 = vperm.xlu1 %572, %v218_v39  }
  0xed   :  { %255 = vperm.xlu1 %572, %v217_v38  }
  0xf1   :  { %250 = vperm.xlu1 %572, %v216_v37  }
  0xf5   :  { %245 = vperm.xlu1 %572, %v215_v36  }
  0xf9   :  { %240 = vperm.xlu1 %572, %v214_v35  }
  0xfd   :  { %235 = vperm.xlu1 %572, %v213_v34  }
 0x144   :  { %v301_v52 = vpop.permute.xlu1 %300 }
 0x145   :  { %vm326_vm11 = vcmp.ge.f32.partialorder %v301_v52, %v707_v53 }
 0x148   :  { %v306_v54 = vpop.permute.xlu0 %305  ;;  %v296_v55 = vpop.permute.xlu1 %295 }
 0x149   :  { %vm327_vm10 = vcmp.ge.f32.partialorder %v306_v54, %v707_v53  ;;  %vm325_vm12 = vcmp.ge.f32.partialorder %v296_v55, %v707_v53 }
 0x14a   :  { %532 = vmatpush3.msk.msra.mxu0 %vm327_vm10, %v604_v56 }
 0x14b   :  { %533 = vmatprep.subr.mxu0 %v602_v48 }
 0x14c   :  { %534 = vmatpush3.msk.msra.mxu0 %vm326_vm11, %v604_v56  ;;  %v291_v57 = vpop.permute.xlu1 %290  ;;  %v231_v10 = vpop.permute.xlu0 %230 }
 0x14d   :  { %535 = vmatprep.subr.mxu0 %v602_v48  ;;  %vm324_vm13 = vcmp.ge.f32.partialorder %v291_v57, %v707_v53  ;;  %vm312_vm11 = vcmp.ge.f32.partialorder %v231_v10, %v707_v53 }
 0x14e   :  { %536 = vmatpush3.msk.msra.mxu0 %vm325_vm12, %v604_v56  ;;  %vm183_vm12 = vcmp.eq.f32.partialorder %v694_v29, 0.0 }
 0x14f   :  { %537 = vmatprep.subr.mxu0 %v602_v48  ;;  %v481_v5 = vsel %vm183_vm12, 1.0, %v602_v48 }
 0x150   :  { %538 = vmatpush3.msk.msra.mxu0 %vm324_vm13, %v604_v56  ;;  %v286_v58 = vpop.permute.xlu1 %285  ;;  %v186_v14 = vsel %vm87_vm1, %v481_v5, 0.0  ;;  %vm446_vm13 = vcmask 1042434  }
 0x151   :  { %vm323_vm14 = vcmp.ge.f32.partialorder %v286_v58, %v707_v53  ;;  %539 = vmatprep.subr.mxu0 %v602_v48  ;;  %v447_v15 = vsel %vm446_vm13, %v186_v14, 0.0  ;;  %v440_v22 = vrot.slane %v186_v14, 2 }
 0x152   :  { %540 = vmatpush3.msk.msra.mxu0 %vm323_vm14, %v604_v56  ;;  %448 = vadd.xlane.f32.xlu1 %v447_v15 }
 0x153   :  { %541 = vmatprep.subr.mxu0 %v602_v48 }
 0x154   :  { %v281_v59 = vpop.permute.xlu1 %280 }
 0x155   :  { %vm322_vm15 = vcmp.ge.f32.partialorder %v281_v59, %v707_v53 }
 0x156   :  { %542 = vmatpush3.msk.msra.mxu0 %vm322_vm15, %v604_v56 }
 0x157   :  { %543 = vmatprep.subr.mxu0 %v602_v48 }
 0x158   :  { %v276_v60 = vpop.permute.xlu1 %275 }
 0x159   :  { %vm321_vm0 = vcmp.ge.f32.partialorder %v276_v60, %v707_v53 }
 0x15a   :  { %544 = vmatpush3.msk.msra.mxu0 %vm321_vm0, %v604_v56 }
 0x15b   :  { %545 = vmatprep.subr.mxu0 %v602_v48 }
 0x15c   :  { %v271_v61 = vpop.permute.xlu1 %270 }
 0x15d   :  { %vm320_vm2 = vcmp.ge.f32.partialorder %v271_v61, %v707_v53 }
 0x15e   :  { %546 = vmatpush3.msk.msra.mxu0 %vm320_vm2, %v604_v56 }
 0x15f   :  { %547 = vmatprep.subr.mxu0 %v602_v48 }
 0x160   :  { %v266_v63 = vpop.permute.xlu1 %265 }
 0x161   :  { %vm319_vm3 = vcmp.ge.f32.partialorder %v266_v63, %v707_v53 }
 0x162   :  { %548 = vmatpush3.msk.msra.mxu0 %vm319_vm3, %v604_v56 }
 0x163   :  { %549 = vmatprep.subr.mxu0 %v602_v48 }
 0x164   :  { %v261_v1 = vpop.permute.xlu1 %260 }
 0x165   :  { %vm318_vm4 = vcmp.ge.f32.partialorder %v261_v1, %v707_v53 }
 0x166   :  { %550 = vmatpush3.msk.msra.mxu0 %vm318_vm4, %v604_v56 }
 0x167   :  { %551 = vmatprep.subr.mxu0 %v602_v48 }
 0x168   :  { %v256_v2 = vpop.permute.xlu1 %255 }
 0x169   :  { %vm317_vm5 = vcmp.ge.f32.partialorder %v256_v2, %v707_v53 }
 0x16a   :  { %552 = vmatpush3.msk.msra.mxu0 %vm317_vm5, %v604_v56 }
 0x16b   :  { %553 = vmatprep.subr.mxu0 %v602_v48 }
 0x16c   :  { %v251_v3 = vpop.permute.xlu1 %250 }
 0x16d   :  { %vm316_vm6 = vcmp.ge.f32.partialorder %v251_v3, %v707_v53 }
 0x16e   :  { %554 = vmatpush3.msk.msra.mxu0 %vm316_vm6, %v604_v56 }
 0x16f   :  { %555 = vmatprep.subr.mxu0 %v602_v48 }
 0x170   :  { %v246_v4 = vpop.permute.xlu1 %245 }
 0x171   :  { %vm315_vm7 = vcmp.ge.f32.partialorder %v246_v4, %v707_v53 }
 0x172   :  { %556 = vmatpush3.msk.msra.mxu0 %vm315_vm7, %v604_v56 }
 0x173   :  { %557 = vmatprep.subr.mxu0 %v602_v48 }
 0x174   :  { %v241_v7 = vpop.permute.xlu1 %240 }
 0x175   :  { %vm314_vm9 = vcmp.ge.f32.partialorder %v241_v7, %v707_v53 }
 0x176   :  { %558 = vmatpush3.msk.msra.mxu0 %vm314_vm9, %v604_v56 }
 0x177   :  { %559 = vmatprep.subr.mxu0 %v602_v48 }
 0x178   :  { %v236_v11 = vpop.permute.xlu1 %235 }
 0x179   :  { %vm313_vm10 = vcmp.ge.f32.partialorder %v236_v11, %v707_v53 }
 0x17a   :  { %560 = vmatpush3.msk.msra.mxu0 %vm313_vm10, %v604_v56 }
 0x17b   :  { %561 = vmatprep.subr.mxu0 %v602_v48 }
 0x17c   :  { %562 = vmatpush3.msk.msra.mxu0 %vm312_vm11, %v604_v56 }
 0x17d   :  { %564 = vmatmul.mubr.f32.vlgmr.msra.gmra.mxu0 %v363_v13 }
 0x1db   :  { %v449_v26 = vpop.xlane.xlu1 %448 }
 0x1dc   :  { %v451_v27 = vmul.f32 8.0, %v449_v26 }
 0x1de   :  { %v453_v28 = vrot.slane %v451_v27, 2 }
 0x23d   :  { %v430_v16 = vpop.f32.mrf.mxu0 }
 0x23e   :  { %v434_v17 = vsel %vm87_vm1, %v430_v16, 1.0  ;;  %vm457_vm1 = vcmask 0  }
 0x23f   :  { %575 = vlog2.f32 %v434_v17  ;;  %v565_v18 = vpop.f32.mrf.mxu0 }
 0x240   :  { %577 = vrcp.f32 %v453_v28 }
 0x24c   :  { %v576_v19 = vpop.eup %575 }
 0x24d   :  { %v436_v20 = vmul.f32 0.6931472, %v576_v19  ;;  %v578_v30 = vpop.eup %577 }
 0x24f   :  { %v437_v21 = vadd.f32 %v436_v20, %v703_v50 }
 0x251   :  { %v438_v23 = vsub.f32 %v694_v29, %v437_v21 }
 0x253   :  { %v442_v24 = vmul.f32 %v440_v22, %v438_v23 }
 0x255   :  { %v443_v25 = vsel %vm188_vm8, %v442_v24, 0.0 }
 0x256   :  { %444 = vadd.xlane.f32.xlu0 %v443_v25 }
 0x2df   :  { %v445_v6 = vpop.xlane.xlu0 %444 }
 0x2e0   :  { %v450_v31 = vsub.f32 0.0, %v445_v6 }
 0x2e2   :  { %v456_v32 = vmul.f32 %v578_v30, %v450_v31 }
 0x2e4   :  { %458 = vst.msk [vmem:[#allocation17] sm:$0x1] %vm457_vm1, %v456_v32 }
 0x2e5   :  { %590 = shalt.err (!%p587_p4)
}
 0x2e6   :  { %468 = dma.vmem_to_hbm [thread:$0]  %s466_s2, 16, %s780_s7, [#allocation18]  }
 0x2e7   :  { %599 = dma.done.wait [#allocation18], 16  }
 0x2e8   :  { %600 = vsyncadd [#allocation18], 4294967280 }
 0x2e9   :  { %472 = vsyncpa [#allocation18], 1 }

</bundles_post_ra>
